<compile_context>
chip_gen: v5e
topology: v5e:2x2
jax: 0.10.0
libtpu: 0.0.40
codegen_flags: <defaults>
</compile_context>

<pallas_src>
import functools

import numpy as np
import jax
import jax.numpy as jnp
from jax import lax
from jax.experimental import pallas as pl
from jax.experimental.pallas import tpu as pltpu


def _conv1x1_bn_kernel(x_ref, w_ref, bias_ref, o_ref, acc_ref, *, compute_dtype):
    """One (Cout-tile, HW-tile) output block of one batch element, reduced
    over Cin chunks (grid axis 3, innermost, "arbitrary").

    x_ref:    (T_Cin, T_HW)    activation chunk, native dtype (cast in-kernel)
    w_ref:    (T_Cout, T_Cin)  BN-scale-folded weight chunk (compute_dtype)
    bias_ref: (T_Cout, 1)      folded BN bias (f32)
    o_ref:    (T_Cout, T_HW)   output tile
    acc_ref:  (T_Cout, T_HW)   f32 accumulator scratch
    """
    k = pl.program_id(3)

    @pl.when(k == 0)
    def _():
        acc_ref[...] = jnp.zeros_like(acc_ref)

    # Cast on the VPU (hides under MXU/DMA): keeps the HBM read of x at its
    # native width instead of a separate wrapper-side astype round trip.
    x = x_ref[...].astype(compute_dtype)
    acc_ref[...] += jnp.dot(w_ref[...], x, preferred_element_type=jnp.float32)

    @pl.when(k == pl.num_programs(3) - 1)
    def _():
        o_ref[...] = (acc_ref[...] + bias_ref[...]).astype(o_ref.dtype)


def _round_up(x, m):
    return ((x + m - 1) // m) * m


def _vmem_capacity_bytes():
    """Physical VMEM per TensorCore (falls back to 128 MiB if unqueryable)."""
    try:
        info = pltpu.get_tpu_info()
        for attr in ("vmem_capacity_bytes", "vmem_bytes", "vmem_size_bytes"):
            v = getattr(info, attr, None)
            if v:
                return int(v)
    except Exception:
        pass
    return 128 * 1024 * 1024


def _choose_tiles(hw, cin, cout, x_bytes, w_bytes, out_bytes, desired_hw, budget):
    """Pick (tile_cout, tile_cin, tile_hw) that are layout-legal and fit budget."""
    # Lane (H*W) tile: as large as possible (multiple of 256 preferred, 128
    # legal); small feature maps take the full dim (full-dim escape of the
    # (8,128) rule). Ragged trailing blocks are masked by Pallas.
    if hw <= 256:
        t_hw_max = hw
    else:
        t_hw_max = min(_round_up(desired_hw, 256), (hw // 128) * 128)

    # Cin (reduction) chunk candidates: must divide cin exactly -- padding the
    # reduction dim would pull garbage into the accumulator.
    k_cands = [cin] + [k for k in (1024, 512, 256) if k < cin and cin % k == 0]

    def cout_tile(tile_k):
        # Only split Cout when the double-buffered weight block is genuinely
        # large (bytes-based, not a fixed channel threshold). Prefer 256-row
        # tiles (v6e/v7x MXU is 2x256x256; 128 rows half-fill it).
        if 2 * cout * tile_k * w_bytes <= 8 * 1024 * 1024:
            return cout
        for c in (256, 128):
            if cout % c == 0:
                return c
        return cout

    def vmem_bytes(tile_k, tile_co, t_hw):
        return (2 * tile_k * t_hw * x_bytes        # x chunk, double-buffered
                + 2 * tile_co * tile_k * w_bytes   # weight chunk, double-buffered
                + 2 * tile_co * t_hw * out_bytes   # output tile, double-buffered
                + tile_co * t_hw * 4               # f32 accumulator scratch
                + 8 * tile_co)                     # bias

    best = (cout, cin, t_hw_max)
    for tile_k in k_cands:
        tile_co = cout_tile(tile_k)
        t_hw = t_hw_max
        while (t_hw > 128 and t_hw % 128 == 0
               and vmem_bytes(tile_k, tile_co, t_hw) > budget):
            t_hw -= 128
        best = (tile_co, tile_k, t_hw)
        if (vmem_bytes(tile_k, tile_co, t_hw) <= budget
                and t_hw >= min(512, t_hw_max)):
            break  # lane tile stayed large -> stop splitting Cin further
    return best


def conv1x1_bn(x_nchw, weight, gamma, beta, running_mean, running_var,
               *, stride=1, eps=1e-5, tile_hw=512, compute_dtype=jnp.bfloat16,
               out_dtype=None, vmem_budget_bytes=None):
    """1x1 conv (no bias, groups=1) + BatchNorm2d (eval).  No non-linearity.

    Args:
      x_nchw: (N, Cin, H, W) input, NCHW like PyTorch.
      weight: (Cout, Cin, 1, 1) conv weight (PyTorch layout).
      gamma, beta, running_mean, running_var: (Cout,) BN parameters.
      stride: spatial stride of the 1x1 conv (pure subsampling).
      tile_hw: desired lane-dim tile over H*W.
      compute_dtype: MXU input dtype (default bf16 fast path; accumulation is
        always f32). Pass jnp.float32 for exact f32 MXU inputs.
      out_dtype: output dtype; defaults to x dtype.
      vmem_budget_bytes: override the per-generation VMEM tile budget (tests).
    Returns:
      (N, Cout, H_out, W_out) output, NCHW.
    """
    n, cin, h, w = x_nchw.shape
    cout = weight.shape[0]
    out_dtype = x_nchw.dtype if out_dtype is None else out_dtype

    # Stride on a 1x1 conv is pure spatial subsampling.
    if stride != 1:
        x_nchw = x_nchw[:, :, ::stride, ::stride]
    h_out, w_out = x_nchw.shape[2], x_nchw.shape[3]
    hw = h_out * w_out

    # NCHW -> (N, Cin, H*W): metadata-only reshape. NOTE: no dtype cast here;
    # the activation is cast inside the kernel (saves an HBM round trip).
    x_hw = x_nchw.reshape(n, cin, hw)

    # Fold BatchNorm (inference) into weight / bias in f32, then cast weight.
    scale = gamma.astype(jnp.float32) / jnp.sqrt(
        running_var.astype(jnp.float32) + eps)                       # (Cout,)
    bias = beta.astype(jnp.float32) - running_mean.astype(jnp.float32) * scale
    w_mat = weight.reshape(cout, cin).astype(jnp.float32)
    w_folded = (w_mat * scale[:, None]).astype(compute_dtype)        # (Cout, Cin)
    bias = bias.reshape(cout, 1)                                     # (Cout, 1) f32

    # Per-generation VMEM limit / tile budget (v7x: ~48/40 MiB; v5e/v6e: ~96/81).
    vmem_cap = _vmem_capacity_bytes()
    vmem_limit = min(int(vmem_cap * 0.75), 100 * 1024 * 1024)
    if vmem_budget_bytes is None:
        vmem_budget_bytes = int(vmem_limit * 0.85)

    x_bytes = np.dtype(x_hw.dtype).itemsize
    w_bytes = np.dtype(compute_dtype).itemsize
    out_bytes = np.dtype(out_dtype).itemsize
    tile_co, tile_k, t_hw = _choose_tiles(hw, cin, cout, x_bytes, w_bytes,
                                          out_bytes, tile_hw, vmem_budget_bytes)

    # Grid order (N, HW-tile, Cout-tile, Cin-chunk):
    #   * co between j and k -> the x block index (b, k, j) is invariant across
    #     co, so splitting Cout never re-reads the activation within a k chunk.
    #   * k innermost + "arbitrary" -> f32 accumulator is valid across the
    #     reduction sweep for one output tile.
    grid = (n, pl.cdiv(hw, t_hw), cout // tile_co, cin // tile_k)

    out = pl.pallas_call(
        functools.partial(_conv1x1_bn_kernel, compute_dtype=compute_dtype),
        out_shape=jax.ShapeDtypeStruct((n, cout, hw), out_dtype),
        grid_spec=pltpu.PrefetchScalarGridSpec(
            num_scalar_prefetch=0,
            grid=grid,
            in_specs=[
                # activation chunk (T_Cin, T_HW) of batch element b
                pl.BlockSpec((None, tile_k, t_hw), lambda b, j, co, k: (b, k, j)),
                # folded weight chunk
                pl.BlockSpec((tile_co, tile_k), lambda b, j, co, k: (co, k)),
                # folded bias block
                pl.BlockSpec((tile_co, 1), lambda b, j, co, k: (co, 0)),
            ],
            out_specs=pl.BlockSpec((None, tile_co, t_hw),
                                   lambda b, j, co, k: (b, co, j)),
            scratch_shapes=[pltpu.VMEM((tile_co, t_hw), jnp.float32)],
        ),
        compiler_params=pltpu.CompilerParams(
            dimension_semantics=("parallel", "parallel", "parallel", "arbitrary"),
            vmem_limit_bytes=vmem_limit,
        ),
    )(x_hw, w_folded, bias)

    # (N, Cout, H*W) -> NCHW: metadata-only reshape.
    return out.reshape(n, cout, h_out, w_out)


def _reference(x_nchw, weight, gamma, beta, running_mean, running_var,
               *, stride=1, eps=1e-5):
    """Pure-JAX reference (conv1x1 + BN, inference, NO activation)."""
    if stride != 1:
        x_nchw = x_nchw[:, :, ::stride, ::stride]
    cout, cin = weight.shape[0], weight.shape[1]
    w_mat = weight.reshape(cout, cin)
    y = jnp.einsum("nchw,oc->nohw", x_nchw, w_mat,
                   precision=lax.Precision.HIGHEST)
    scale = (gamma / jnp.sqrt(running_var + eps)).reshape(1, cout, 1, 1)
    bias = (beta - running_mean * gamma / jnp.sqrt(running_var + eps)
            ).reshape(1, cout, 1, 1)
    return y * scale + bias


def _run_case(x, weight, gamma, beta, mean, var, *, stride, tol, **kw):
    fn = jax.jit(functools.partial(conv1x1_bn, stride=stride, **kw))
    out = fn(x, weight, gamma, beta, mean, var)
    jax.block_until_ready(out)
    ref = _reference(x, weight, gamma, beta, mean, var, stride=stride)
    assert out.shape == ref.shape, (out.shape, ref.shape)
    err = float(jnp.max(jnp.abs(out.astype(jnp.float32) - ref)))
    assert err <= tol, f"max abs err {err} > tol {tol}"


def _make_params(key, n, cin, h, w, cout):
    k_x, k_w, k_g, k_b, k_m, k_v = jax.random.split(key, 6)
    x = jax.random.normal(k_x, (n, cin, h, w), dtype=jnp.float32)
    weight = jax.random.normal(k_w, (cout, cin, 1, 1), dtype=jnp.float32) * 0.1
    gamma = jax.random.normal(k_g, (cout,), dtype=jnp.float32) * 0.1 + 1.0
    beta = jax.random.normal(k_b, (cout,), dtype=jnp.float32) * 0.1
    mean = jax.random.normal(k_m, (cout,), dtype=jnp.float32) * 0.1
    var = jax.random.uniform(k_v, (cout,), dtype=jnp.float32,
                             minval=0.5, maxval=1.5)
    return x, weight, gamma, beta, mean, var


if __name__ == "__main__":
    key = jax.random.PRNGKey(0)
    k0, k1, k2 = jax.random.split(key, 3)

    # Base shapes: N=2, Cin=4, H=W=16, Cout=8.
    p = _make_params(k0, 2, 4, 16, 16, 8)

    # 1) f32 MXU path, stride=1 (tight tolerance).
    _run_case(*p, stride=1, tol=1e-4, compute_dtype=jnp.float32)

    # 2) default bf16 MXU path (f32 accumulation), looser tolerance.
    _run_case(*p, stride=1, tol=5e-2)

    # 3) strided variant (stride=2 -> H*W = 64 < 128: full-dim lane tile).
    _run_case(*p, stride=2, tol=1e-4, compute_dtype=jnp.float32)

    # 4) ragged trailing H*W tile (20x20 -> 400 columns, lane tile 384):
    #    exercises Pallas output masking of the partial last block.
    p_rag = _make_params(k1, 1, 4, 20, 20, 8)
    _run_case(*p_rag, stride=1, tol=1e-4, compute_dtype=jnp.float32)

    # 5) Cin-reduction grid axis: Cin=512 with a tiny VMEM budget forces
    #    tile_k=256 -> a 2-step accumulated reduction.
    p_k = _make_params(k2, 1, 512, 16, 16, 8)
    _run_case(*p_k, stride=1, tol=1e-3, compute_dtype=jnp.float32,
              vmem_budget_bytes=600_000)

    print("KERNEL_OK")
</pallas_src>

<mosaic_0001>
module attributes {stable_mosaic.version = 11 : i64} {
  func.func @_conv1x1_bn_kernel(%arg0: i32, %arg1: i32, %arg2: i32, %arg3: i32, %arg4: memref<1x4x256xf32, #tpu.memory_space<vmem>>, %arg5: memref<8x4xf32, #tpu.memory_space<vmem>>, %arg6: memref<8x1xf32, #tpu.memory_space<vmem>>, %arg7: memref<1x8x256xf32, #tpu.memory_space<vmem>>, %arg8: memref<8x256xf32, #tpu.memory_space<vmem>>) attributes {dimension_semantics = [#tpu.dimension_semantics<parallel>, #tpu.dimension_semantics<parallel>, #tpu.dimension_semantics<parallel>, #tpu.dimension_semantics<arbitrary>], iteration_bounds = array<i64: 2, 1, 1, 1>, scalar_prefetch = 0 : i64, scratch_operands = 1 : i64, tpu.core_type = #tpu.core_type<tc>, window_params = [{transform_indices = @transform_0, window_bounds = array<i64: 1, 4, 256>}, {transform_indices = @transform_1, window_bounds = array<i64: 8, 4>}, {transform_indices = @transform_2, window_bounds = array<i64: 8, 1>}, {transform_indices = @transform_3, window_bounds = array<i64: 1, 8, 256>}]} {
    %c0_i32 = arith.constant 0 : i32
    %0 = arith.cmpi eq, %arg3, %c0_i32 : i32
    %1 = arith.extui %0 : i1 to i32
    %c0_i32_0 = arith.constant 0 : i32
    %2 = arith.cmpi ne, %1, %c0_i32_0 : i32
    scf.if %2 {
      %cst_11 = arith.constant 0.000000e+00 : f32
      %13 = vector.broadcast %cst_11 : f32 to vector<8x256xf32>
      %c0_12 = arith.constant 0 : index
      %c0_13 = arith.constant 0 : index
      %14 = vector.load %arg8[%c0_12, %c0_13] : memref<8x256xf32, #tpu.memory_space<vmem>>, vector<8x256xf32>
      tpu.vector_store %arg8[%c0_12, %c0_13], %13 {strides = array<i32>} : memref<8x256xf32, #tpu.memory_space<vmem>>, vector<8x256xf32>,
    } else {
    }
    %c0 = arith.constant 0 : index
    %c0_1 = arith.constant 0 : index
    %c0_2 = arith.constant 0 : index
    %3 = vector.load %arg4[%c0, %c0_1, %c0_2] : memref<1x4x256xf32, #tpu.memory_space<vmem>>, vector<1x4x256xf32>
    %4 = vector.shape_cast %3 : vector<1x4x256xf32> to vector<4x256xf32>
    %c0_3 = arith.constant 0 : index
    %c0_4 = arith.constant 0 : index
    %5 = vector.load %arg8[%c0_3, %c0_4] : memref<8x256xf32, #tpu.memory_space<vmem>>, vector<8x256xf32>
    %c0_5 = arith.constant 0 : index
    %c0_6 = arith.constant 0 : index
    %6 = vector.load %arg5[%c0_5, %c0_6] : memref<8x4xf32, #tpu.memory_space<vmem>>, vector<8x4xf32>
    %cst = arith.constant dense<0.000000e+00> : vector<8x256xf32>
    %7 = tpu.matmul %6, %4, %cst {dimension_numbers = #tpu.dot_dimension_numbers<[1], [0], [0], [1], [0, 0, 1, 1], [], []>} : vector<8x4xf32>, vector<4x256xf32>, vector<8x256xf32> -> vector<8x256xf32>
    %8 = arith.addf %5, %7 : vector<8x256xf32>
    %c0_7 = arith.constant 0 : index
    %c0_8 = arith.constant 0 : index
    %9 = vector.load %arg8[%c0_7, %c0_8] : memref<8x256xf32, #tpu.memory_space<vmem>>, vector<8x256xf32>
    tpu.vector_store %arg8[%c0_7, %c0_8], %8 {strides = array<i32>} : memref<8x256xf32, #tpu.memory_space<vmem>>, vector<8x256xf32>,
    %c0_i32_9 = arith.constant 0 : i32
    %10 = arith.cmpi eq, %arg3, %c0_i32_9 : i32
    %11 = arith.extui %10 : i1 to i32
    %c0_i32_10 = arith.constant 0 : i32
    %12 = arith.cmpi ne, %11, %c0_i32_10 : i32
    scf.if %12 {
      %c0_11 = arith.constant 0 : index
      %c0_12 = arith.constant 0 : index
      %13 = vector.load %arg8[%c0_11, %c0_12] : memref<8x256xf32, #tpu.memory_space<vmem>>, vector<8x256xf32>
      %c0_13 = arith.constant 0 : index
      %c0_14 = arith.constant 0 : index
      %14 = vector.load %arg6[%c0_13, %c0_14] : memref<8x1xf32, #tpu.memory_space<vmem>>, vector<8x1xf32>
      %15 = vector.broadcast %14 : vector<8x1xf32> to vector<8x256xf32>
      %16 = arith.addf %13, %15 : vector<8x256xf32>
      %c0_15 = arith.constant 0 : index
      %c0_16 = arith.constant 0 : index
      %c0_17 = arith.constant 0 : index
      %17 = vector.load %arg7[%c0_15, %c0_16, %c0_17] : memref<1x8x256xf32, #tpu.memory_space<vmem>>, vector<1x8x256xf32>
      %18 = vector.shape_cast %17 : vector<1x8x256xf32> to vector<8x256xf32>
      %19 = vector.shape_cast %16 : vector<8x256xf32> to vector<1x8x256xf32>
      tpu.vector_store %arg7[%c0_15, %c0_16, %c0_17], %19 {strides = array<i32>} : memref<1x8x256xf32, #tpu.memory_space<vmem>>, vector<1x8x256xf32>,
    } else {
    }
    return
  }
  func.func @transform_0(%arg0: i32, %arg1: i32, %arg2: i32, %arg3: i32) -> (i32, i32, i32) {
    %c0_i32 = arith.constant 0 : i32
    return %arg0, %arg3, %arg1 : i32, i32, i32
  }
  func.func @transform_1(%arg0: i32, %arg1: i32, %arg2: i32, %arg3: i32) -> (i32, i32) {
    %c0_i32 = arith.constant 0 : i32
    return %arg2, %arg3 : i32, i32
  }
  func.func @transform_2(%arg0: i32, %arg1: i32, %arg2: i32, %arg3: i32) -> (i32, i32) {
    %c0_i32 = arith.constant 0 : i32
    %c0_i32_0 = arith.constant 0 : i32
    return %arg2, %c0_i32 : i32, i32
  }
  func.func @transform_3(%arg0: i32, %arg1: i32, %arg2: i32, %arg3: i32) -> (i32, i32, i32) {
    %c0_i32 = arith.constant 0 : i32
    return %arg0, %arg2, %arg1 : i32, i32, i32
  }
}

</mosaic_0001>

<bundles_post_ra>
// kernel: conv1x1_bn.1
= control target key start
LH: loop header
LB: loop body
LE: loop exit
PB: predicated region body
PF: predicated region fallthrough
CT: control target
= control target key end

     0   :  { %s613_s12 = smov 0   ;;  %s615_s13 = smov 0   ;;  %s652_s0 = inlined_call_operand.vmem [shape: f32[2,4,256], index: 0, kind: input, shape index: {}]   ;;  %s653_s1 = inlined_call_operand.vmem [shape: f32[8,4], index: 1, kind: input, shape index: {}]   ;;  %s654_s2 = inlined_call_operand.vmem [shape: f32[8,1], index: 2, kind: input, shape index: {}]   ;;  %s655_s3 = inlined_call_operand.vmem [shape: f32[2,8,256], index: 3, kind: output, shape index: {}]  }
   0x1   :  { %s617_s14 = smov 0  }
   0x2 LB: > { %s39_s15 = sadd.s32 1, %s586_s13  ;;  %p529_p0 = scmp.ge.s32.totalorder %s590_s14, 1  ;;  %s590_s14 = sphi %s617_s14, %s13_s14   ;;  %s586_s13 = sphi %s615_s13, %s657_s13   ;;  %s582_s12 = sphi %s613_s12, %s656_s12  }
   0x3   : > { %p41_p1 = scmp.ge.s32.totalorder %s39_s15, 2  ;;  %p203_p2 = scmp.lt.s32.totalorder %s590_s14, 3 }
   0x5   : > { %s659_s15 = smov (%p41_p1, %s39_s15), 0  ;;  %p204_p3 = pnand %p529_p0, %p203_p2 }
   0x6   : > { %p255_p4 = scmp.lt.s32.totalorder (!%p204_p3), %s582_s12, 1 }
   0x7   : > { %207 = sbr.rel (%p204_p3) target bundleno = 155 (0x9b), region = 32 }
   0xc   : > { %v365_v0 = vld [vmem:[%s654_s2] sm:$0xff]  ;;  %v592_v1 = vmov 0   ;;  %s661_s12 = smov (!%p255_p4, %s582_s12), 1  ;;  %vm311_vm0 = vcmask 1043456   ;;  %vm307_vm1 = vcmask 31744  }
   0xd   : > { %567 = vset.pattern.permute.xlu0 %v592_v1  ;;  %s540_s18 = sshll.u32 %s661_s12, 3  ;;  %v302_v3 = vld [vmem:[%s653_s1] sm:$0xff]  ;;  %s541_s24 = sshll.u32 %s661_s12, 4 }
   0xe   : > { %368 = vperm.xlu0 %567, %v365_v0   ;;  %s266_s21 = scalar_lea.vmem %s652_s0, %s540_s18  ;;  %s291_s27 = scalar_lea.vmem %s655_s3, %s541_s24 }
   0xf   : > { %v299_v2 = vld [vmem:[%s266_s21] sm:$0xff] }
  0x10   : > { %304 = vst [vmem:[#allocation1] ss:$2 sm:$0xff] %v299_v2 }
  0x17   : > { %v305_v4 = vld.sshfl [vmem:[#allocation1] sm:$0xff pattern:$0x75316420]  ;;  %v306_v5 = vld.sshfl [vmem:[#allocation1 + $0x8] sm:$0xff pattern:$0x75316420] }
  0x18   : > { %534 = vmatpush.msk.msra.mxu0 %vm311_vm0, %v305_v4  ;;  %536 = vmatpush.msk.msra.mxu1 %vm311_vm0, %v306_v5 }
  0x19   : > { %535 = vmatmul.msk.f32.vlgmr.msra.gmra.mxu0 %vm307_vm1, %v302_v3  ;;  %537 = vmatmul.msk.f32.vlgmr.msra.gmra.mxu1 %vm307_vm1, %v302_v3 }
  0x80   : > { %v369_v6 = vpop.permute.xlu0 %368 }
  0x96   : > { %v333_v7 = vpop.f32.mrf.mxu0  ;;  %v353_v8 = vpop.f32.mrf.mxu1 }
  0x97   : > { %v371_v9 = vadd.f32 %v369_v6, %v333_v7  ;;  %v372_v10 = vadd.f32 %v369_v6, %v353_v8 }
  0x99   : > { %373 = vst [vmem:[%s291_s27] sm:$0xff] %v371_v9 }
  0x9a   : > { %374 = vst [vmem:[%s291_s27 + $0x8] sm:$0xff] %v372_v10 }
  0x9b PF: > { %s13_s14 = sadd.s32 1, %s590_s14   ;;  %s656_s12 = smov %s586_s13 }
  0x9c   : > { %p10_p5 = scmp.ge.s32.totalorder %s13_s14, 4   ;;  %s657_s13 = smov %s659_s15 }
  0x9e   :  { %12 = sbr.rel (!%p10_p5) target bundleno = 2 (0x2), region = 76 }

</bundles_post_ra>
